<compile_context>
chip_gen: v7x
topology: tpu7x:2x2x1
jax: 0.10.0
libtpu: 0.0.40
codegen_flags: <defaults>
</compile_context>

<pallas_src>
import functools

import jax
import jax.numpy as jnp
from jax.experimental import pallas as pl
from jax.experimental.pallas import tpu as pltpu

NEG_INF = -1e30

# ---------------------------------------------------------------------------
# Packed-parameter row layout (rows of the (P_ROWS, D) parameter tensor)
# ---------------------------------------------------------------------------
ROW_GCN_B = 0
ROW_BN1_SCALE = 1
ROW_BN1_SHIFT = 2
ROW_AGGCN_B = 3
ROW_AGBN1_SCALE = 4
ROW_AGBN1_SHIFT = 5
ROW_GAT_B = 6
ROW_GAT2_B = 7
ROW_AGBN2_SCALE_X = 8    # applied to x_2   (first half of agbn2)
ROW_AGBN2_SCALE_H = 9    # applied to h_ag  (second half of agbn2)
ROW_AGBN2_SHIFT_X = 10
ROW_AGBN2_SHIFT_H = 11
ROW_BN2_SCALE_X = 12     # applied to x_1   (first half of bn2)
ROW_BN2_SCALE_H = 13     # applied to h_ab  (second half of bn2)
ROW_BN2_SHIFT_X = 14
ROW_BN2_SHIFT_H = 15
ROW_AGFC_W_X = 16        # Linear(2D,1) weight, first-half row vector
ROW_AGFC_W_H = 17        # Linear(2D,1) weight, second-half row vector
ROW_FC_W_X = 18
ROW_FC_W_H = 19
ROW_AGFC_B = 20          # scalar (broadcast across the row)
ROW_FC_B = 21            # scalar (broadcast across the row)
P_ROWS = 22


# ---------------------------------------------------------------------------
# Fused Pallas kernel: entire EpiEPMP forward in one invocation
# ---------------------------------------------------------------------------
def fused_epi_epmp_kernel(adj_ab_ref, x_ab_ref, adj_ag_ref, x_ag_ref,
                          bias_ref, gcn_w_ref, aggcn_w_ref,
                          gat_wz_ref, gat2_wz_ref, p_ref,
                          out_ab_ref, out_ag_ref,
                          h_sc, *, n_ab, n_ag, d):
    def row(i):
        return p_ref[i:i + 1, :]          # (1, D), broadcast over sublanes

    # ---- gcn -> bn1 -> relu  (dropout1 = identity in eval) ----
    hab = jnp.dot(x_ab_ref[...], gcn_w_ref[...], preferred_element_type=jnp.float32)
    hab = jnp.dot(adj_ab_ref[...], hab, preferred_element_type=jnp.float32) + row(ROW_GCN_B)
    hab = jnp.maximum(hab * row(ROW_BN1_SCALE) + row(ROW_BN1_SHIFT), 0.0)
    h_sc[0:n_ab, :] = hab

    # ---- aggcn -> agbn1 -> relu ----
    hag = jnp.dot(x_ag_ref[...], aggcn_w_ref[...], preferred_element_type=jnp.float32)
    hag = jnp.dot(adj_ag_ref[...], hag, preferred_element_type=jnp.float32) + row(ROW_AGGCN_B)
    hag = jnp.maximum(hag * row(ROW_AGBN1_SCALE) + row(ROW_AGBN1_SHIFT), 0.0)
    h_sc[n_ab:n_ab + n_ag, :] = hag

    bias = bias_ref[...]                  # 0 on edges/self-loops, -1e30 elsewhere

    # ---- dense single-head GATConv (attention dropout = identity in eval) ----
    def gat(x, wz_ref, b_row):
        # fused projection: [H | H a_dst | H a_src] in one MXU contraction
        z = jnp.dot(x, wz_ref[...], preferred_element_type=jnp.float32)   # (N, D+2)
        h = z[:, 0:d]
        s_dst = z[:, d:d + 1]
        s_src = z[:, d + 1:d + 2]
        e = s_dst + jnp.transpose(s_src)          # row = target, col = source
        e = jnp.where(e > 0, e, 0.2 * e) + bias   # LeakyReLU(0.2) + edge mask
        m = jnp.max(e, axis=-1, keepdims=True)
        p = jnp.exp(e - m)                        # masked entries underflow to 0
        p = p * pl.reciprocal(jnp.sum(p, axis=-1, keepdims=True), approx=True)
        return jnp.dot(p, h, preferred_element_type=jnp.float32) + b_row

    x1 = jnp.maximum(gat(h_sc[...], gat_wz_ref, row(ROW_GAT_B)), 0.0)
    x2 = gat(x1, gat2_wz_ref, row(ROW_GAT2_B))

    # ---- heads: cat -> BN(2D) -> relu -> Linear(2D,1), as two half-width
    #      affine+relu+lane-reduce contributions (identical math, no MXU) ----
    x_1 = x2[0:n_ab, :]
    x_2 = x2[n_ab:n_ab + n_ag, :]
    hab = h_sc[0:n_ab, :]
    hag = h_sc[n_ab:n_ab + n_ag, :]

    ya = jnp.maximum(x_2 * row(ROW_AGBN2_SCALE_X) + row(ROW_AGBN2_SHIFT_X), 0.0)
    yb = jnp.maximum(hag * row(ROW_AGBN2_SCALE_H) + row(ROW_AGBN2_SHIFT_H), 0.0)
    out_ag_ref[...] = (jnp.sum(ya * row(ROW_AGFC_W_X), axis=-1, keepdims=True)
                       + jnp.sum(yb * row(ROW_AGFC_W_H), axis=-1, keepdims=True)
                       + p_ref[ROW_AGFC_B:ROW_AGFC_B + 1, 0:1])

    za = jnp.maximum(x_1 * row(ROW_BN2_SCALE_X) + row(ROW_BN2_SHIFT_X), 0.0)
    zb = jnp.maximum(hab * row(ROW_BN2_SCALE_H) + row(ROW_BN2_SHIFT_H), 0.0)
    out_ab_ref[...] = (jnp.sum(za * row(ROW_FC_W_X), axis=-1, keepdims=True)
                       + jnp.sum(zb * row(ROW_FC_W_H), axis=-1, keepdims=True)
                       + p_ref[ROW_FC_B:ROW_FC_B + 1, 0:1])


def fused_forward_call(inputs, n_ab, n_ag, d):
    kernel = functools.partial(fused_epi_epmp_kernel, n_ab=n_ab, n_ag=n_ag, d=d)
    return pl.pallas_call(
        kernel,
        out_shape=(jax.ShapeDtypeStruct((n_ab, 1), jnp.float32),
                   jax.ShapeDtypeStruct((n_ag, 1), jnp.float32)),
        in_specs=[pl.BlockSpec(memory_space=pltpu.MemorySpace.VMEM)
                  for _ in inputs],
        out_specs=(pl.BlockSpec(memory_space=pltpu.MemorySpace.VMEM),
                   pl.BlockSpec(memory_space=pltpu.MemorySpace.VMEM)),
        scratch_shapes=[pltpu.VMEM((n_ab + n_ag, d), jnp.float32)],
    )(*inputs)


# ---------------------------------------------------------------------------
# Plain-JAX glue: graph preprocessing + deterministic parameter construction
# ---------------------------------------------------------------------------
def edges_to_sym_adj(edge_index, n):
    # one-hot matmul instead of a serialized scatter
    src, dst = edge_index[0], edge_index[1]
    oh_src = jax.nn.one_hot(src, n, dtype=jnp.float32)   # (E, N)
    oh_dst = jax.nn.one_hot(dst, n, dtype=jnp.float32)   # (E, N)
    a = jnp.minimum(jnp.dot(oh_dst.T, oh_src), 1.0)      # A[dst, src] = 1
    return jnp.maximum(a, a.T)                           # treat as undirected


def gcn_norm_adj(adj):
    n = adj.shape[0]
    a_hat = jnp.maximum(adj, jnp.eye(n, dtype=jnp.float32))   # add self loops
    dinv = 1.0 / jnp.sqrt(jnp.sum(a_hat, axis=1))
    return a_hat * dinv[:, None] * dinv[None, :]


def gat_bias(adj):
    n = adj.shape[0]
    mask = jnp.maximum(adj, jnp.eye(n, dtype=jnp.float32))    # add self loops
    return jnp.where(mask > 0, 0.0, NEG_INF).astype(jnp.float32)


def bn_affine(key, dim):
    k1, k2, k3, k4 = jax.random.split(key, 4)
    gamma = 1.0 + 0.1 * jax.random.normal(k1, (1, dim), jnp.float32)
    beta = 0.1 * jax.random.normal(k2, (1, dim), jnp.float32)
    rmean = 0.1 * jax.random.normal(k3, (1, dim), jnp.float32)
    rvar = 1.0 + 0.1 * jnp.abs(jax.random.normal(k4, (1, dim), jnp.float32))
    scale = gamma / jnp.sqrt(rvar + 1e-5)
    shift = beta - rmean * scale
    return scale, shift


def init_params(key, num_feats, inner_dim):
    d = inner_dim
    ks = iter(jax.random.split(key, 32))

    def w(shape, scale=0.1):
        return scale * jax.random.normal(next(ks), shape, jnp.float32)

    p = {}
    p["gcn_w"], p["gcn_b"] = w((num_feats, d)), w((1, d))
    p["aggcn_w"], p["aggcn_b"] = w((num_feats, d)), w((1, d))
    p["bn1_scale"], p["bn1_shift"] = bn_affine(next(ks), d)
    p["agbn1_scale"], p["agbn1_shift"] = bn_affine(next(ks), d)
    for name in ("gat", "gat2"):
        p[f"{name}_w"] = w((d, d))
        p[f"{name}_asrc"] = w((d, 1))
        p[f"{name}_adst"] = w((d, 1))
        p[f"{name}_b"] = w((1, d))
    agbn2_scale, agbn2_shift = bn_affine(next(ks), 2 * d)
    bn2_scale, bn2_shift = bn_affine(next(ks), 2 * d)
    p["agbn2_scale1"], p["agbn2_scale2"] = agbn2_scale[:, :d], agbn2_scale[:, d:]
    p["agbn2_shift1"], p["agbn2_shift2"] = agbn2_shift[:, :d], agbn2_shift[:, d:]
    p["bn2_scale1"], p["bn2_scale2"] = bn2_scale[:, :d], bn2_scale[:, d:]
    p["bn2_shift1"], p["bn2_shift2"] = bn2_shift[:, :d], bn2_shift[:, d:]
    p["agfc_w1"], p["agfc_w2"], p["agfc_b"] = w((d, 1)), w((d, 1)), w((1, 1))
    p["fc_w1"], p["fc_w2"], p["fc_b"] = w((d, 1)), w((d, 1)), w((1, 1))
    return p


def pack_params(p, d):
    # rows must match ROW_* constants above
    rows = [
        p["gcn_b"], p["bn1_scale"], p["bn1_shift"],
        p["aggcn_b"], p["agbn1_scale"], p["agbn1_shift"],
        p["gat_b"], p["gat2_b"],
        p["agbn2_scale1"], p["agbn2_scale2"],
        p["agbn2_shift1"], p["agbn2_shift2"],
        p["bn2_scale1"], p["bn2_scale2"],
        p["bn2_shift1"], p["bn2_shift2"],
        p["agfc_w1"].T, p["agfc_w2"].T,
        p["fc_w1"].T, p["fc_w2"].T,
        jnp.broadcast_to(p["agfc_b"], (1, d)),
        jnp.broadcast_to(p["fc_b"], (1, d)),
    ]
    packed = jnp.concatenate(rows, axis=0)
    assert packed.shape == (P_ROWS, d)
    return packed


def fuse_gat_weights(w, a_dst, a_src):
    # z = x @ [W | W a_dst | W a_src]  ->  h, s_dst, s_src in one matmul
    return jnp.concatenate([w, jnp.dot(w, a_dst), jnp.dot(w, a_src)], axis=1)


@functools.partial(jax.jit, static_argnames=("inner_dim",))
def epi_epmp_forward(params, x_ab, x_ag, edge_x_ab, edge_x_ag, edge_index_d,
                     inner_dim):
    n_ab, n_ag = x_ab.shape[0], x_ag.shape[0]
    d = inner_dim

    # Graph preprocessing (depends only on the graph; cache across calls if
    # the graph is static).
    adj_ab = gcn_norm_adj(edges_to_sym_adj(edge_x_ab, n_ab))
    adj_ag = gcn_norm_adj(edges_to_sym_adj(edge_x_ag, n_ag))
    bias_d = gat_bias(edges_to_sym_adj(edge_index_d, n_ab + n_ag))

    gat_wz = fuse_gat_weights(params["gat_w"], params["gat_adst"], params["gat_asrc"])
    gat2_wz = fuse_gat_weights(params["gat2_w"], params["gat2_adst"], params["gat2_asrc"])
    pp = pack_params(params, d)

    inputs = (adj_ab, x_ab, adj_ag, x_ag, bias_d,
              params["gcn_w"], params["aggcn_w"], gat_wz, gat2_wz, pp)
    out_ab, out_ag = fused_forward_call(inputs, n_ab, n_ag, d)
    return out_ab, out_ag


def random_edges(key, n, num_edges):
    k1, k2 = jax.random.split(key)
    src = jax.random.randint(k1, (num_edges,), 0, n)
    dst = jax.random.randint(k2, (num_edges,), 0, n)
    return jnp.stack([src, dst])


if __name__ == "__main__":
    NUM_FEATS = 32      # num_cdr_feats == num_ag_feats -> inner_dim = 32
    INNER_DIM = 32
    N_AB, N_AG = 16, 16

    key = jax.random.PRNGKey(0)
    k_par, k_xab, k_xag, k_eab, k_eag, k_ed = jax.random.split(key, 6)

    params = init_params(k_par, NUM_FEATS, INNER_DIM)
    x_ab = jax.random.normal(k_xab, (N_AB, NUM_FEATS), jnp.float32)
    x_ag = jax.random.normal(k_xag, (N_AG, NUM_FEATS), jnp.float32)
    edge_x_ab = random_edges(k_eab, N_AB, 48)
    edge_x_ag = random_edges(k_eag, N_AG, 48)
    edge_index_d = random_edges(k_ed, N_AB + N_AG, 96)

    out_ab, out_ag = epi_epmp_forward(params, x_ab, x_ag, edge_x_ab, edge_x_ag,
                                      edge_index_d, INNER_DIM)
    jax.block_until_ready((out_ab, out_ag))
    assert out_ab.shape == (N_AB, 1) and out_ag.shape == (N_AG, 1)
    assert bool(jnp.all(jnp.isfinite(out_ab))) and bool(jnp.all(jnp.isfinite(out_ag)))
    print("KERNEL_OK")
</pallas_src>

<mosaic_0001>
module attributes {stable_mosaic.version = 11 : i64} {
  func.func @fused_epi_epmp_kernel(%arg0: memref<16x16xf32, #tpu.memory_space<vmem>>, %arg1: memref<16x32xf32, #tpu.memory_space<vmem>>, %arg2: memref<16x16xf32, #tpu.memory_space<vmem>>, %arg3: memref<16x32xf32, #tpu.memory_space<vmem>>, %arg4: memref<32x32xf32, #tpu.memory_space<vmem>>, %arg5: memref<32x32xf32, #tpu.memory_space<vmem>>, %arg6: memref<32x32xf32, #tpu.memory_space<vmem>>, %arg7: memref<32x34xf32, #tpu.memory_space<vmem>>, %arg8: memref<32x34xf32, #tpu.memory_space<vmem>>, %arg9: memref<22x32xf32, #tpu.memory_space<vmem>>, %arg10: memref<16x1xf32, #tpu.memory_space<vmem>>, %arg11: memref<16x1xf32, #tpu.memory_space<vmem>>, %arg12: memref<32x32xf32, #tpu.memory_space<vmem>>) attributes {dimension_semantics = [], scalar_prefetch = 0 : i64, scratch_operands = 1 : i64, tpu.core_type = #tpu.core_type<tc>} {
    %c0 = arith.constant 0 : index
    %c0_0 = arith.constant 0 : index
    %0 = vector.load %arg1[%c0, %c0_0] : memref<16x32xf32, #tpu.memory_space<vmem>>, vector<16x32xf32>
    %c0_1 = arith.constant 0 : index
    %c0_2 = arith.constant 0 : index
    %1 = vector.load %arg5[%c0_1, %c0_2] : memref<32x32xf32, #tpu.memory_space<vmem>>, vector<32x32xf32>
    %cst = arith.constant dense<0.000000e+00> : vector<16x32xf32>
    %2 = tpu.matmul %0, %1, %cst {dimension_numbers = #tpu.dot_dimension_numbers<[1], [0], [0], [1], [0, 0, 1, 1], [], []>} : vector<16x32xf32>, vector<32x32xf32>, vector<16x32xf32> -> vector<16x32xf32>
    %c0_3 = arith.constant 0 : index
    %c0_4 = arith.constant 0 : index
    %3 = vector.load %arg0[%c0_3, %c0_4] : memref<16x16xf32, #tpu.memory_space<vmem>>, vector<16x16xf32>
    %cst_5 = arith.constant dense<0.000000e+00> : vector<16x32xf32>
    %4 = tpu.matmul %3, %2, %cst_5 {dimension_numbers = #tpu.dot_dimension_numbers<[1], [0], [0], [1], [0, 0, 1, 1], [], []>} : vector<16x16xf32>, vector<16x32xf32>, vector<16x32xf32> -> vector<16x32xf32>
    %c0_6 = arith.constant 0 : index
    %c0_7 = arith.constant 0 : index
    %5 = vector.load %arg9[%c0_6, %c0_7] : memref<22x32xf32, #tpu.memory_space<vmem>>, vector<1x32xf32>
    %6 = vector.broadcast %5 : vector<1x32xf32> to vector<16x32xf32>
    %7 = arith.addf %4, %6 : vector<16x32xf32>
    %c1 = arith.constant 1 : index
    %c0_8 = arith.constant 0 : index
    %8 = vector.load %arg9[%c1, %c0_8] : memref<22x32xf32, #tpu.memory_space<vmem>>, vector<1x32xf32>
    %9 = vector.broadcast %8 : vector<1x32xf32> to vector<16x32xf32>
    %10 = arith.mulf %7, %9 : vector<16x32xf32>
    %c2 = arith.constant 2 : index
    %c0_9 = arith.constant 0 : index
    %11 = vector.load %arg9[%c2, %c0_9] : memref<22x32xf32, #tpu.memory_space<vmem>>, vector<1x32xf32>
    %12 = vector.broadcast %11 : vector<1x32xf32> to vector<16x32xf32>
    %13 = arith.addf %10, %12 : vector<16x32xf32>
    %cst_10 = arith.constant 0.000000e+00 : f32
    %14 = vector.broadcast %cst_10 : f32 to vector<16x32xf32>
    %15 = arith.maximumf %13, %14 : vector<16x32xf32>
    %c0_11 = arith.constant 0 : index
    %c0_12 = arith.constant 0 : index
    %16 = vector.load %arg12[%c0_11, %c0_12] : memref<32x32xf32, #tpu.memory_space<vmem>>, vector<16x32xf32>
    tpu.vector_store %arg12[%c0_11, %c0_12], %15 {strides = array<i32>} : memref<32x32xf32, #tpu.memory_space<vmem>>, vector<16x32xf32>,
    %c0_13 = arith.constant 0 : index
    %c0_14 = arith.constant 0 : index
    %17 = vector.load %arg3[%c0_13, %c0_14] : memref<16x32xf32, #tpu.memory_space<vmem>>, vector<16x32xf32>
    %c0_15 = arith.constant 0 : index
    %c0_16 = arith.constant 0 : index
    %18 = vector.load %arg6[%c0_15, %c0_16] : memref<32x32xf32, #tpu.memory_space<vmem>>, vector<32x32xf32>
    %cst_17 = arith.constant dense<0.000000e+00> : vector<16x32xf32>
    %19 = tpu.matmul %17, %18, %cst_17 {dimension_numbers = #tpu.dot_dimension_numbers<[1], [0], [0], [1], [0, 0, 1, 1], [], []>} : vector<16x32xf32>, vector<32x32xf32>, vector<16x32xf32> -> vector<16x32xf32>
    %c0_18 = arith.constant 0 : index
    %c0_19 = arith.constant 0 : index
    %20 = vector.load %arg2[%c0_18, %c0_19] : memref<16x16xf32, #tpu.memory_space<vmem>>, vector<16x16xf32>
    %cst_20 = arith.constant dense<0.000000e+00> : vector<16x32xf32>
    %21 = tpu.matmul %20, %19, %cst_20 {dimension_numbers = #tpu.dot_dimension_numbers<[1], [0], [0], [1], [0, 0, 1, 1], [], []>} : vector<16x16xf32>, vector<16x32xf32>, vector<16x32xf32> -> vector<16x32xf32>
    %c3 = arith.constant 3 : index
    %c0_21 = arith.constant 0 : index
    %22 = vector.load %arg9[%c3, %c0_21] : memref<22x32xf32, #tpu.memory_space<vmem>>, vector<1x32xf32>
    %23 = vector.broadcast %22 : vector<1x32xf32> to vector<16x32xf32>
    %24 = arith.addf %21, %23 : vector<16x32xf32>
    %c4 = arith.constant 4 : index
    %c0_22 = arith.constant 0 : index
    %25 = vector.load %arg9[%c4, %c0_22] : memref<22x32xf32, #tpu.memory_space<vmem>>, vector<1x32xf32>
    %26 = vector.broadcast %25 : vector<1x32xf32> to vector<16x32xf32>
    %27 = arith.mulf %24, %26 : vector<16x32xf32>
    %c5 = arith.constant 5 : index
    %c0_23 = arith.constant 0 : index
    %28 = vector.load %arg9[%c5, %c0_23] : memref<22x32xf32, #tpu.memory_space<vmem>>, vector<1x32xf32>
    %29 = vector.broadcast %28 : vector<1x32xf32> to vector<16x32xf32>
    %30 = arith.addf %27, %29 : vector<16x32xf32>
    %cst_24 = arith.constant 0.000000e+00 : f32
    %31 = vector.broadcast %cst_24 : f32 to vector<16x32xf32>
    %32 = arith.maximumf %30, %31 : vector<16x32xf32>
    %c16 = arith.constant 16 : index
    %c0_25 = arith.constant 0 : index
    %33 = vector.load %arg12[%c16, %c0_25] : memref<32x32xf32, #tpu.memory_space<vmem>>, vector<16x32xf32>
    tpu.vector_store %arg12[%c16, %c0_25], %32 {strides = array<i32>} : memref<32x32xf32, #tpu.memory_space<vmem>>, vector<16x32xf32>,
    %c0_26 = arith.constant 0 : index
    %c0_27 = arith.constant 0 : index
    %34 = vector.load %arg4[%c0_26, %c0_27] : memref<32x32xf32, #tpu.memory_space<vmem>>, vector<32x32xf32>
    %c0_28 = arith.constant 0 : index
    %c0_29 = arith.constant 0 : index
    %35 = vector.load %arg12[%c0_28, %c0_29] : memref<32x32xf32, #tpu.memory_space<vmem>>, vector<32x32xf32>
    %c6 = arith.constant 6 : index
    %c0_30 = arith.constant 0 : index
    %36 = vector.load %arg9[%c6, %c0_30] : memref<22x32xf32, #tpu.memory_space<vmem>>, vector<1x32xf32>
    %c0_31 = arith.constant 0 : index
    %c0_32 = arith.constant 0 : index
    %37 = vector.load %arg7[%c0_31, %c0_32] : memref<32x34xf32, #tpu.memory_space<vmem>>, vector<32x34xf32>
    %cst_33 = arith.constant dense<0.000000e+00> : vector<32x34xf32>
    %38 = tpu.matmul %35, %37, %cst_33 {dimension_numbers = #tpu.dot_dimension_numbers<[1], [0], [0], [1], [0, 0, 1, 1], [], []>} : vector<32x32xf32>, vector<32x34xf32>, vector<32x34xf32> -> vector<32x34xf32>
    %39 = vector.extract_strided_slice %38 {offsets = [0, 0], sizes = [32, 32], strides = [1, 1]} : vector<32x34xf32> to vector<32x32xf32>
    %40 = vector.extract_strided_slice %38 {offsets = [0, 32], sizes = [32, 1], strides = [1, 1]} : vector<32x34xf32> to vector<32x1xf32>
    %41 = vector.extract_strided_slice %38 {offsets = [0, 33], sizes = [32, 1], strides = [1, 1]} : vector<32x34xf32> to vector<32x1xf32>
    %42 = tpu.transpose %41, [1, 0] : vector<32x1xf32> -> vector<1x32xf32>
    %43 = vector.broadcast %40 : vector<32x1xf32> to vector<32x32xf32>
    %44 = vector.broadcast %42 : vector<1x32xf32> to vector<32x32xf32>
    %45 = arith.addf %43, %44 : vector<32x32xf32>
    %cst_34 = arith.constant 0.000000e+00 : f32
    %46 = vector.broadcast %cst_34 : f32 to vector<32x32xf32>
    %47 = arith.cmpf ogt, %45, %46 : vector<32x32xf32>
    %cst_35 = arith.constant 2.000000e-01 : f32
    %48 = vector.broadcast %cst_35 : f32 to vector<32x32xf32>
    %49 = arith.mulf %48, %45 : vector<32x32xf32>
    %50 = arith.select %47, %45, %49 : vector<32x32xi1>, vector<32x32xf32>
    %51 = arith.addf %50, %34 : vector<32x32xf32>
    %cst_36 = arith.constant dense<0xFF800000> : vector<32xf32>
    %52 = vector.multi_reduction <maximumf>, %51, %cst_36 [1] : vector<32x32xf32> to vector<32xf32>
    %53 = vector.shape_cast %52 : vector<32xf32> to vector<32x1xf32>
    %54 = vector.broadcast %53 : vector<32x1xf32> to vector<32x32xf32>
    %55 = arith.subf %51, %54 : vector<32x32xf32>
    %56 = math.exp %55 : vector<32x32xf32>
    %cst_37 = arith.constant dense<0.000000e+00> : vector<32xf32>
    %57 = vector.multi_reduction <add>, %56, %cst_37 [1] : vector<32x32xf32> to vector<32xf32>
    %58 = vector.shape_cast %57 : vector<32xf32> to vector<32x1xf32>
    %59 = tpu.reciprocal %58 {approx = true} : vector<32x1xf32> -> vector<32x1xf32>
    %60 = vector.broadcast %59 : vector<32x1xf32> to vector<32x32xf32>
    %61 = arith.mulf %56, %60 : vector<32x32xf32>
    %cst_38 = arith.constant dense<0.000000e+00> : vector<32x32xf32>
    %62 = tpu.matmul %61, %39, %cst_38 {dimension_numbers = #tpu.dot_dimension_numbers<[1], [0], [0], [1], [0, 0, 1, 1], [], []>} : vector<32x32xf32>, vector<32x32xf32>, vector<32x32xf32> -> vector<32x32xf32>
    %63 = vector.broadcast %36 : vector<1x32xf32> to vector<32x32xf32>
    %64 = arith.addf %62, %63 : vector<32x32xf32>
    %cst_39 = arith.constant 0.000000e+00 : f32
    %65 = vector.broadcast %cst_39 : f32 to vector<32x32xf32>
    %66 = arith.maximumf %64, %65 : vector<32x32xf32>
    %c7 = arith.constant 7 : index
    %c0_40 = arith.constant 0 : index
    %67 = vector.load %arg9[%c7, %c0_40] : memref<22x32xf32, #tpu.memory_space<vmem>>, vector<1x32xf32>
    %c0_41 = arith.constant 0 : index
    %c0_42 = arith.constant 0 : index
    %68 = vector.load %arg8[%c0_41, %c0_42] : memref<32x34xf32, #tpu.memory_space<vmem>>, vector<32x34xf32>
    %cst_43 = arith.constant dense<0.000000e+00> : vector<32x34xf32>
    %69 = tpu.matmul %66, %68, %cst_43 {dimension_numbers = #tpu.dot_dimension_numbers<[1], [0], [0], [1], [0, 0, 1, 1], [], []>} : vector<32x32xf32>, vector<32x34xf32>, vector<32x34xf32> -> vector<32x34xf32>
    %70 = vector.extract_strided_slice %69 {offsets = [0, 0], sizes = [32, 32], strides = [1, 1]} : vector<32x34xf32> to vector<32x32xf32>
    %71 = vector.extract_strided_slice %69 {offsets = [0, 32], sizes = [32, 1], strides = [1, 1]} : vector<32x34xf32> to vector<32x1xf32>
    %72 = vector.extract_strided_slice %69 {offsets = [0, 33], sizes = [32, 1], strides = [1, 1]} : vector<32x34xf32> to vector<32x1xf32>
    %73 = tpu.transpose %72, [1, 0] : vector<32x1xf32> -> vector<1x32xf32>
    %74 = vector.broadcast %71 : vector<32x1xf32> to vector<32x32xf32>
    %75 = vector.broadcast %73 : vector<1x32xf32> to vector<32x32xf32>
    %76 = arith.addf %74, %75 : vector<32x32xf32>
    %cst_44 = arith.constant 0.000000e+00 : f32
    %77 = vector.broadcast %cst_44 : f32 to vector<32x32xf32>
    %78 = arith.cmpf ogt, %76, %77 : vector<32x32xf32>
    %cst_45 = arith.constant 2.000000e-01 : f32
    %79 = vector.broadcast %cst_45 : f32 to vector<32x32xf32>
    %80 = arith.mulf %79, %76 : vector<32x32xf32>
    %81 = arith.select %78, %76, %80 : vector<32x32xi1>, vector<32x32xf32>
    %82 = arith.addf %81, %34 : vector<32x32xf32>
    %cst_46 = arith.constant dense<0xFF800000> : vector<32xf32>
    %83 = vector.multi_reduction <maximumf>, %82, %cst_46 [1] : vector<32x32xf32> to vector<32xf32>
    %84 = vector.shape_cast %83 : vector<32xf32> to vector<32x1xf32>
    %85 = vector.broadcast %84 : vector<32x1xf32> to vector<32x32xf32>
    %86 = arith.subf %82, %85 : vector<32x32xf32>
    %87 = math.exp %86 : vector<32x32xf32>
    %cst_47 = arith.constant dense<0.000000e+00> : vector<32xf32>
    %88 = vector.multi_reduction <add>, %87, %cst_47 [1] : vector<32x32xf32> to vector<32xf32>
    %89 = vector.shape_cast %88 : vector<32xf32> to vector<32x1xf32>
    %90 = tpu.reciprocal %89 {approx = true} : vector<32x1xf32> -> vector<32x1xf32>
    %91 = vector.broadcast %90 : vector<32x1xf32> to vector<32x32xf32>
    %92 = arith.mulf %87, %91 : vector<32x32xf32>
    %cst_48 = arith.constant dense<0.000000e+00> : vector<32x32xf32>
    %93 = tpu.matmul %92, %70, %cst_48 {dimension_numbers = #tpu.dot_dimension_numbers<[1], [0], [0], [1], [0, 0, 1, 1], [], []>} : vector<32x32xf32>, vector<32x32xf32>, vector<32x32xf32> -> vector<32x32xf32>
    %94 = vector.broadcast %67 : vector<1x32xf32> to vector<32x32xf32>
    %95 = arith.addf %93, %94 : vector<32x32xf32>
    %96 = vector.extract_strided_slice %95 {offsets = [0, 0], sizes = [16, 32], strides = [1, 1]} : vector<32x32xf32> to vector<16x32xf32>
    %97 = vector.extract_strided_slice %95 {offsets = [16, 0], sizes = [16, 32], strides = [1, 1]} : vector<32x32xf32> to vector<16x32xf32>
    %c0_49 = arith.constant 0 : index
    %c0_50 = arith.constant 0 : index
    %98 = vector.load %arg12[%c0_49, %c0_50] : memref<32x32xf32, #tpu.memory_space<vmem>>, vector<16x32xf32>
    %c16_51 = arith.constant 16 : index
    %c0_52 = arith.constant 0 : index
    %99 = vector.load %arg12[%c16_51, %c0_52] : memref<32x32xf32, #tpu.memory_space<vmem>>, vector<16x32xf32>
    %c8 = arith.constant 8 : index
    %c0_53 = arith.constant 0 : index
    %100 = vector.load %arg9[%c8, %c0_53] : memref<22x32xf32, #tpu.memory_space<vmem>>, vector<1x32xf32>
    %101 = vector.broadcast %100 : vector<1x32xf32> to vector<16x32xf32>
    %102 = arith.mulf %97, %101 : vector<16x32xf32>
    %c10 = arith.constant 10 : index
    %c0_54 = arith.constant 0 : index
    %103 = vector.load %arg9[%c10, %c0_54] : memref<22x32xf32, #tpu.memory_space<vmem>>, vector<1x32xf32>
    %104 = vector.broadcast %103 : vector<1x32xf32> to vector<16x32xf32>
    %105 = arith.addf %102, %104 : vector<16x32xf32>
    %cst_55 = arith.constant 0.000000e+00 : f32
    %106 = vector.broadcast %cst_55 : f32 to vector<16x32xf32>
    %107 = arith.maximumf %105, %106 : vector<16x32xf32>
    %c9 = arith.constant 9 : index
    %c0_56 = arith.constant 0 : index
    %108 = vector.load %arg9[%c9, %c0_56] : memref<22x32xf32, #tpu.memory_space<vmem>>, vector<1x32xf32>
    %109 = vector.broadcast %108 : vector<1x32xf32> to vector<16x32xf32>
    %110 = arith.mulf %99, %109 : vector<16x32xf32>
    %c11 = arith.constant 11 : index
    %c0_57 = arith.constant 0 : index
    %111 = vector.load %arg9[%c11, %c0_57] : memref<22x32xf32, #tpu.memory_space<vmem>>, vector<1x32xf32>
    %112 = vector.broadcast %111 : vector<1x32xf32> to vector<16x32xf32>
    %113 = arith.addf %110, %112 : vector<16x32xf32>
    %cst_58 = arith.constant 0.000000e+00 : f32
    %114 = vector.broadcast %cst_58 : f32 to vector<16x32xf32>
    %115 = arith.maximumf %113, %114 : vector<16x32xf32>
    %c16_59 = arith.constant 16 : index
    %c0_60 = arith.constant 0 : index
    %116 = vector.load %arg9[%c16_59, %c0_60] : memref<22x32xf32, #tpu.memory_space<vmem>>, vector<1x32xf32>
    %117 = vector.broadcast %116 : vector<1x32xf32> to vector<16x32xf32>
    %118 = arith.mulf %107, %117 : vector<16x32xf32>
    %cst_61 = arith.constant dense<0.000000e+00> : vector<16xf32>
    %119 = vector.multi_reduction <add>, %118, %cst_61 [1] : vector<16x32xf32> to vector<16xf32>
    %120 = vector.shape_cast %119 : vector<16xf32> to vector<16x1xf32>
    %c17 = arith.constant 17 : index
    %c0_62 = arith.constant 0 : index
    %121 = vector.load %arg9[%c17, %c0_62] : memref<22x32xf32, #tpu.memory_space<vmem>>, vector<1x32xf32>
    %122 = vector.broadcast %121 : vector<1x32xf32> to vector<16x32xf32>
    %123 = arith.mulf %115, %122 : vector<16x32xf32>
    %cst_63 = arith.constant dense<0.000000e+00> : vector<16xf32>
    %124 = vector.multi_reduction <add>, %123, %cst_63 [1] : vector<16x32xf32> to vector<16xf32>
    %125 = vector.shape_cast %124 : vector<16xf32> to vector<16x1xf32>
    %126 = arith.addf %120, %125 : vector<16x1xf32>
    %c20 = arith.constant 20 : index
    %c0_64 = arith.constant 0 : index
    %127 = vector.load %arg9[%c20, %c0_64] : memref<22x32xf32, #tpu.memory_space<vmem>>, vector<1x1xf32>
    %128 = vector.broadcast %127 : vector<1x1xf32> to vector<16x1xf32>
    %129 = arith.addf %126, %128 : vector<16x1xf32>
    %c0_65 = arith.constant 0 : index
    %c0_66 = arith.constant 0 : index
    %130 = vector.load %arg11[%c0_65, %c0_66] : memref<16x1xf32, #tpu.memory_space<vmem>>, vector<16x1xf32>
    tpu.vector_store %arg11[%c0_65, %c0_66], %129 {strides = array<i32>} : memref<16x1xf32, #tpu.memory_space<vmem>>, vector<16x1xf32>,
    %c12 = arith.constant 12 : index
    %c0_67 = arith.constant 0 : index
    %131 = vector.load %arg9[%c12, %c0_67] : memref<22x32xf32, #tpu.memory_space<vmem>>, vector<1x32xf32>
    %132 = vector.broadcast %131 : vector<1x32xf32> to vector<16x32xf32>
    %133 = arith.mulf %96, %132 : vector<16x32xf32>
    %c14 = arith.constant 14 : index
    %c0_68 = arith.constant 0 : index
    %134 = vector.load %arg9[%c14, %c0_68] : memref<22x32xf32, #tpu.memory_space<vmem>>, vector<1x32xf32>
    %135 = vector.broadcast %134 : vector<1x32xf32> to vector<16x32xf32>
    %136 = arith.addf %133, %135 : vector<16x32xf32>
    %cst_69 = arith.constant 0.000000e+00 : f32
    %137 = vector.broadcast %cst_69 : f32 to vector<16x32xf32>
    %138 = arith.maximumf %136, %137 : vector<16x32xf32>
    %c13 = arith.constant 13 : index
    %c0_70 = arith.constant 0 : index
    %139 = vector.load %arg9[%c13, %c0_70] : memref<22x32xf32, #tpu.memory_space<vmem>>, vector<1x32xf32>
    %140 = vector.broadcast %139 : vector<1x32xf32> to vector<16x32xf32>
    %141 = arith.mulf %98, %140 : vector<16x32xf32>
    %c15 = arith.constant 15 : index
    %c0_71 = arith.constant 0 : index
    %142 = vector.load %arg9[%c15, %c0_71] : memref<22x32xf32, #tpu.memory_space<vmem>>, vector<1x32xf32>
    %143 = vector.broadcast %142 : vector<1x32xf32> to vector<16x32xf32>
    %144 = arith.addf %141, %143 : vector<16x32xf32>
    %cst_72 = arith.constant 0.000000e+00 : f32
    %145 = vector.broadcast %cst_72 : f32 to vector<16x32xf32>
    %146 = arith.maximumf %144, %145 : vector<16x32xf32>
    %c18 = arith.constant 18 : index
    %c0_73 = arith.constant 0 : index
    %147 = vector.load %arg9[%c18, %c0_73] : memref<22x32xf32, #tpu.memory_space<vmem>>, vector<1x32xf32>
    %148 = vector.broadcast %147 : vector<1x32xf32> to vector<16x32xf32>
    %149 = arith.mulf %138, %148 : vector<16x32xf32>
    %cst_74 = arith.constant dense<0.000000e+00> : vector<16xf32>
    %150 = vector.multi_reduction <add>, %149, %cst_74 [1] : vector<16x32xf32> to vector<16xf32>
    %151 = vector.shape_cast %150 : vector<16xf32> to vector<16x1xf32>
    %c19 = arith.constant 19 : index
    %c0_75 = arith.constant 0 : index
    %152 = vector.load %arg9[%c19, %c0_75] : memref<22x32xf32, #tpu.memory_space<vmem>>, vector<1x32xf32>
    %153 = vector.broadcast %152 : vector<1x32xf32> to vector<16x32xf32>
    %154 = arith.mulf %146, %153 : vector<16x32xf32>
    %cst_76 = arith.constant dense<0.000000e+00> : vector<16xf32>
    %155 = vector.multi_reduction <add>, %154, %cst_76 [1] : vector<16x32xf32> to vector<16xf32>
    %156 = vector.shape_cast %155 : vector<16xf32> to vector<16x1xf32>
    %157 = arith.addf %151, %156 : vector<16x1xf32>
    %c21 = arith.constant 21 : index
    %c0_77 = arith.constant 0 : index
    %158 = vector.load %arg9[%c21, %c0_77] : memref<22x32xf32, #tpu.memory_space<vmem>>, vector<1x1xf32>
    %159 = vector.broadcast %158 : vector<1x1xf32> to vector<16x1xf32>
    %160 = arith.addf %157, %159 : vector<16x1xf32>
    %c0_78 = arith.constant 0 : index
    %c0_79 = arith.constant 0 : index
    %161 = vector.load %arg10[%c0_78, %c0_79] : memref<16x1xf32, #tpu.memory_space<vmem>>, vector<16x1xf32>
    tpu.vector_store %arg10[%c0_78, %c0_79], %160 {strides = array<i32>} : memref<16x1xf32, #tpu.memory_space<vmem>>, vector<16x1xf32>,
    return
  }
}

</mosaic_0001>

<bundles_post_ra>
// kernel: epi_epmp_forward.1
= control target key start
LH: loop header
LB: loop body
LE: loop exit
PB: predicated region body
PF: predicated region fallthrough
CT: control target
= control target key end

     0   :  { %vm43_vm0 = vcmask 261120   ;;  %vm132_vm1 = vcmask 130048   ;;  %v1539_v54 = vmov 32   ;;  %s1540_s26 = smov 95   ;;  %vm1176_vm10 = vcmask 7168   ;;  %s1877_s5 = inlined_call_operand.vmem [shape: f32[32,32], index: 5, kind: input, shape index: {}]   ;;  %s1878_s1 = inlined_call_operand.vmem [shape: f32[16,32], index: 1, kind: input, shape index: {}]   ;;  %s1879_s0 = inlined_call_operand.vmem [shape: f32[16,16], index: 0, kind: input, shape index: {}]   ;;  %s1880_s6 = inlined_call_operand.vmem [shape: f32[32,32], index: 6, kind: input, shape index: {}]   ;;  %s1881_s3 = inlined_call_operand.vmem [shape: f32[16,32], index: 3, kind: input, shape index: {}]   ;;  %s1882_s2 = inlined_call_operand.vmem [shape: f32[16,16], index: 2, kind: input, shape index: {}]   ;;  %s1883_s9 = inlined_call_operand.vmem [shape: f32[22,32], index: 9, kind: input, shape index: {}]   ;;  %s1884_s7 = inlined_call_operand.vmem [shape: f32[32,34], index: 7, kind: input, shape index: {}]   ;;  %s1885_s4 = inlined_call_operand.vmem [shape: f32[32,32], index: 4, kind: input, shape index: {}]   ;;  %s1886_s8 = inlined_call_operand.vmem [shape: f32[32,34], index: 8, kind: input, shape index: {}]   ;;  %s1887_s10 = inlined_call_operand.vmem [shape: f32[16,1], index: 10, kind: output, shape index: {0}]   ;;  %s1888_s11 = inlined_call_operand.vmem [shape: f32[16,1], index: 11, kind: output, shape index: {1}]  }
   0x1   :  { %v39_v0 = vld [vmem:[%s1877_s5] sm:$0xff]  ;;  %v40_v1 = vld [vmem:[%s1877_s5 + $0x8] sm:$0xff]  ;;  %v41_v2 = vld [vmem:[%s1877_s5 + $0x10] sm:$0xff]  ;;  %1505 = vset.pattern.permute.xlu0 %v1539_v54  ;;  %1506 = vset.pattern.permute.xlu1 %v1539_v54 }
   0x2   :  { %v1446_v3 = vpack.c.bf16 %v40_v1, %v39_v0  ;;  %v42_v4 = vld [vmem:[%s1877_s5 + $0x18] sm:$0xff]  ;;  %v37_v5 = vld [vmem:[%s1878_s1] sm:$0xff]  ;;  %v38_v7 = vld [vmem:[%s1878_s1 + $0x8] sm:$0xff] }
   0x3   :  { %v1450_v6 = vpack.c.bf16 %v42_v4, %v41_v2  ;;  %1362 = vmatprep.mubr.msk.f32.mxu0 %vm43_vm0, %v37_v5  ;;  %v125_v8 = vld [vmem:[%s1879_s0] sm:$0xff]  ;;  %v235_v10 = vld [vmem:[%s1880_s6 + $0x8] sm:$0xff]  ;;  %v236_v15 = vld [vmem:[%s1880_s6 + $0x10] sm:$0xff] }
   0x4   :  { %1447 = vmatprep.subr.bf16.mxu0 %v1446_v3  ;;  %1369 = vmatprep.mubr.msk.f32.mxu1 %vm132_vm1, %v125_v8  ;;  %v234_v9 = vld [vmem:[%s1880_s6] sm:$0xff]  ;;  %v237_v16 = vld [vmem:[%s1880_s6 + $0x18] sm:$0xff]  ;;  %v126_v17 = vld [vmem:[%s1879_s0 + $0x8] sm:$0xff] }
   0x5   :  { %1449 = vmatpush3.bf16.msra.mxu0 %v1446_v3  ;;  %v1458_v14 = vpack.c.bf16 %v235_v10, %v234_v9  ;;  %v1462_v18 = vpack.c.bf16 %v237_v16, %v236_v15  ;;  %v232_v19 = vld [vmem:[%s1881_s3] sm:$0xff]  ;;  %v233_v20 = vld [vmem:[%s1881_s3 + $0x8] sm:$0xff]  ;;  %v436_v41 = vld [vmem:[%s1884_s7 + $0x10] sm:$0xff]  ;;  %v599_v16 = vlaneseq }
   0x6   :  { %1451 = vmatprep.subr.bf16.mxu0 %v1450_v6  ;;  %v319_v21 = vld [vmem:[%s1882_s2] sm:$0xff]  ;;  %v435_v35 = vld [vmem:[%s1884_s7 + $0x8] sm:$0xff]  ;;  %v437_v42 = vld [vmem:[%s1884_s7 + $0x18] sm:$0xff] }
   0x7   :  { %v1258_v22 = vld [vmem:[%s1883_s9] ss:$0 sm:$0xff]  ;;  %v1261_v24 = vld [vmem:[%s1883_s9 + $0x1] ss:$0 sm:$0xff]  ;;  %v1262_v27 = vld [vmem:[%s1883_s9 + $0x2] ss:$0 sm:$0xff]  ;;  %v1474_v44 = vpack.c.bf16 %v437_v42, %v436_v41 }
   0x8   :  { %v434_v34 = vld [vmem:[%s1884_s7] sm:$0xff]  ;;  %v320_v43 = vld [vmem:[%s1882_s2 + $0x8] sm:$0xff]  ;;  %v1699_v51 = vld [vmem:[%s1883_s9 + $0x13] ss:$0 sm:$0xff] }
   0x9   :  { %1453 = vmatpush3.bf16.msra.mxu0 %v1450_v6  ;;  %v1470_v40 = vpack.c.bf16 %v435_v35, %v434_v34  ;;  %v1682_v45 = vld [vmem:[%s1883_s9 + $0xd] ss:$0 sm:$0xff]  ;;  %v1688_v47 = vld [vmem:[%s1883_s9 + $0xf] ss:$0 sm:$0xff]  ;;  %v1265_v55 = vld [vmem:[%s1883_s9 + $0x3] ss:$0 sm:$0xff] }
   0xa   :  { %v1268_v57 = vld [vmem:[%s1883_s9 + $0x4] ss:$0 sm:$0xff]  ;;  %v1269_v60 = vld [vmem:[%s1883_s9 + $0x5] ss:$0 sm:$0xff] }
   0xc   :  { %1363 = vmatmul.mubr.msk.f32.vlgmr.msra.gmra.mrb[0].mxu0 %vm43_vm0, %v38_v7 }
   0xd   :  { %1387 = vmatprep.mubr.msk.f32.mxu0 %vm132_vm1, %v319_v21 }
  0xdf   :  { %v1364_v11 = vpop.f32.mrb[0].mxu0 }
  0xe0   :  { %v116_v12 = vpop.f32.mrb[1].mxu0 }
  0xe1   :  { %v1454_v13 = vpack.c.bf16 %v1364_v11, %v116_v12 }
  0xe3   :  { %1455 = vmatprep.subr.bf16.mxu1 %v1454_v13 }
  0xe4   :  { %1457 = vmatpush3.bf16.msra.mxu1 %v1454_v13 }
  0xe5   :  { %1459 = vmatprep.subr.bf16.mxu1 %v1458_v14 }
  0xe7   :  { %1370 = vmatmul.mubr.msk.f32.vlgmr.msra.gmra.mrb[0].mxu1 %vm132_vm1, %v126_v17 }
  0xe8   :  { %1461 = vmatpush3.bf16.msra.mxu1 %v1458_v14  ;;  %1380 = vmatprep.mubr.msk.f32.mxu1 %vm43_vm0, %v232_v19 }
  0xe9   :  { %1463 = vmatprep.subr.bf16.mxu1 %v1462_v18 }
  0xec   :  { %1465 = vmatpush3.bf16.msra.mxu1 %v1462_v18  ;;  %v1728_v18 = vshrl.u32 %v599_v16, 7 }
  0xef   :  { %1381 = vmatmul.mubr.msk.f32.vlgmr.msra.gmra.mrb[2].mxu1 %vm43_vm0, %v233_v20  ;;  %v601_v20 = vsub.s32 0, %v1728_v18 }
 0x1ba   :  { %v1371_v23 = vpop.f32.mrb[0].mxu1 }
 0x1bb   :  { %v211_v25 = vadd.f32 %v1371_v23, %v1258_v22  ;;  %v205_v26 = vpop.f32.mrb[1].mxu1 }
 0x1bc   :  { %v206_v28 = vadd.f32 %v1258_v22, %v205_v26 }
 0x1bd   :  { %v220_v29 = vmul.f32 %v1261_v24, %v211_v25 }
 0x1be   :  { %v219_v30 = vmul.f32 %v1261_v24, %v206_v28 }
 0x1bf   :  { %v227_v31 = vadd.f32 %v1262_v27, %v220_v29 }
 0x1c0   :  { %v226_v32 = vadd.f32 %v1262_v27, %v219_v30  ;;  %v1736_v27 = vld [vmem:[%s1885_s4] sm:$0xff] }
 0x1c1   :  { %v229_v33 = vmax.f32 %v227_v31, 0.0 }
 0x1c2   :  { %v228_v36 = vmax.f32 %v226_v32, 0.0  ;;  %v1382_v37 = vpop.f32.mrb[2].mxu1  ;;  %v1741_v32 = vld [vmem:[%s1885_s4 + $0x8] sm:$0xff] }
 0x1c3   :  { %231 = vst.msk [vmem:[#allocation2 + $0x8] sm:$0xff] %vm43_vm0, %v229_v33  ;;  %v310_v38 = vpop.f32.mrb[3].mxu1 }
 0x1c4   :  { %230 = vst.msk [vmem:[#allocation2] sm:$0xff] %vm43_vm0, %v228_v36  ;;  %v1466_v39 = vpack.c.bf16 %v1382_v37, %v310_v38 }
 0x1c6   :  { %1467 = vmatprep.subr.bf16.mxu0 %v1466_v39 }
 0x1c7   :  { %1469 = vmatpush3.bf16.msra.mxu0 %v1466_v39  ;;  %v1749_v39 = vld [vmem:[%s1885_s4 + $0x10] sm:$0xff] }
 0x1c8   :  { %1471 = vmatprep.subr.bf16.mxu0 %v1470_v40 }
 0x1ca   :  { %1388 = vmatmul.mubr.msk.f32.vlgmr.msra.gmra.mrb[2].mxu0 %vm132_vm1, %v320_v43  ;;  %v430_v46 = vld [vmem:[#allocation2 + $0x8] sm:$0xff] }
 0x1cb   :  { %1473 = vmatpush3.bf16.msra.mxu0 %v1470_v40  ;;  %v1690_v48 = vld [vmem:[#allocation2] sm:$0xff]  ;;  %v1201_v49 = vmul.f32 %v1682_v45, %v430_v46 }
 0x1cc   :  { %1398 = vmatprep.mubr.msk.f32.mxu0 %vm43_vm0, %v1690_v48  ;;  %1475 = vmatprep.subr.bf16.mxu0 %v1474_v44 }
 0x1cd   :  { %v1208_v50 = vadd.f32 %v1688_v47, %v1201_v49 }
 0x1cf   :  { %1477 = vmatpush3.bf16.msra.mxu0 %v1474_v44  ;;  %v1210_v52 = vmax.f32 %v1208_v50, 0.0  ;;  %v1756_v44 = vld [vmem:[%s1885_s4 + $0x18] sm:$0xff] }
 0x1d1   :  { %v1702_v53 = vmul.f32 %v1699_v51, %v1210_v52 }
 0x1d2   :  { %1399 = vmatmul.mubr.msk.f32.vlgmr.msra.gmra.mrb[4].mxu0 %vm43_vm0, %v430_v46 }
 0x29d   :  { %v1389_v56 = vpop.f32.mrb[2].mxu0 }
 0x29e   :  { %v404_v58 = vadd.f32 %v1389_v56, %v1265_v55  ;;  %v398_v59 = vpop.f32.mrb[3].mxu0 }
 0x29f   :  { %v399_v61 = vadd.f32 %v1265_v55, %v398_v59 }
 0x2a0   :  { %v413_v62 = vmul.f32 %v1268_v57, %v404_v58 }
 0x2a1   :  { %v412_v63 = vmul.f32 %v1268_v57, %v399_v61 }
 0x2a2   :  { %v420_v0 = vadd.f32 %v1269_v60, %v413_v62 }
 0x2a3   :  { %v419_v1 = vadd.f32 %v1269_v60, %v412_v63 }
 0x2a4   :  { %v422_v2 = vmax.f32 %v420_v0, 0.0 }
 0x2a5   :  { %v421_v3 = vmax.f32 %v419_v1, 0.0  ;;  %v1400_v4 = vpop.f32.mrb[4].mxu0 }
 0x2a6   :  { %424 = vst.msk [vmem:[#allocation2 + $0x18] sm:$0xff] %vm43_vm0, %v422_v2  ;;  %v516_v5 = vpop.f32.mrb[5].mxu0 }
 0x2a7   :  { %423 = vst.msk [vmem:[#allocation2 + $0x10] sm:$0xff] %vm43_vm0, %v421_v3  ;;  %v1478_v6 = vpack.c.bf16 %v1400_v4, %v516_v5  ;;  %539 = vrot.lane.b32.xlu0 %v516_v5, %s1540_s26 }
 0x2a9   :  { %1479 = vmatprep.subr.bf16.mxu1 %v1478_v6 }
 0x2aa   :  { %1481 = vmatpush3.bf16.msra.mxu1 %v1478_v6 }
 0x2ab   :  { %541 = vrot.lane.b32.xlu0 %v1400_v4, %s1540_s26 }
 0x2ad   :  { %v1722_v8 = vld [vmem:[#allocation2 + $0x18] sm:$0xff] }
 0x2ae   :  { %v1718_v7 = vld [vmem:[#allocation2 + $0x10] sm:$0xff] }
 0x2af   :  { %1401 = vmatprep.mubr.msk.f32.mxu0 %vm43_vm0, %v1718_v7  ;;  %584 = vperm.xlu0 %1505, %v516_v5  }
 0x2b0   :  { %1402 = vmatmul.mubr.msk.f32.gmra.mrb[6].mxu0 %vm43_vm0, %v1722_v8 }
 0x319   :  { %v540_v12 = vpop.permute.xlu0 %539 }
 0x31d   :  { %v542_v13 = vpop.permute.xlu0 %541 }
 0x32e   :  { %v585_v23 = vpop.permute.xlu0 %584 }
 0x383   :  { %v1403_v9 = vpop.f32.mrb[6].mxu0 }
 0x384   :  { %596 = vperm.xlu0 %1505, %v1403_v9   ;;  %545 = vrot.lane.b32.xlu1 %v1403_v9, %s1540_s26  ;;  %v526_v10 = vpop.f32.mrb[7].mxu0 }
 0x385   :  { %v1482_v11 = vpack.c.bf16 %v1403_v9, %v526_v10 }
 0x387   :  { %1483 = vmatprep.subr.bf16.mxu1 %v1482_v11 }
 0x388   :  { %543 = vrot.lane.b32.xlu1 %v526_v10, %s1540_s26  ;;  %1485 = vmatpush3.bf16.msra.mxu1 %v1482_v11 }
 0x38c   :  { %588 = vperm.xlu1 %1506, %v1400_v4  }
 0x390   :  { %592 = vperm.xlu1 %1506, %v526_v10  }
 0x3b9   :  { %551 = vxpose.xlu1.b32.start [1/4] (short) (narrow) %v540_v12, 8  ;;  %v773_v12 = vld [vmem:[%s1886_s8] sm:$0xff] }
 0x3bd   :  { %552 = vxpose.xlu1.b32.cont [2/4] (short) (narrow) %v542_v13, 8  ;;  %v774_v13 = vld [vmem:[%s1886_s8 + $0x8] sm:$0xff] }
 0x3f6   :  { %v546_v14 = vpop.permute.xlu1 %545 }
 0x3fa   :  { %v544_v15 = vpop.permute.xlu1 %543 }
 0x3fb   :  { %553 = vxpose.xlu1.b32.cont [3/4] (short) (narrow) %v544_v15, 8 }
 0x3ff   :  { %554 = vxpose.xlu1.b32.end [4/4] (short) (narrow) %v546_v14, 8  ;;  %v1486_v14 = vpack.c.bf16 %v774_v13, %v773_v12 }
 0x401   :  { %1487 = vmatprep.subr.bf16.mxu0 %v1486_v14 }
 0x402   :  { %1489 = vmatpush3.bf16.msra.mxu0 %v1486_v14 }
 0x403   :  { %v597_v30 = vpop.permute.xlu0 %596 }
 0x40b   :  { %v589_v17 = vpop.permute.xlu1 %588 }
 0x40f   :  { %v593_v19 = vpop.permute.xlu1 %592 }
 0x473   :  { %v567_v21 = vpop.trf.xlu1 }
 0x474   :  { %v602_v22 = vrot.slane %v567_v21, %v601_v20 }
 0x476   :  { %v603_v24 = vadd.f32 %v602_v22, %v585_v23  ;;  %v604_v25 = vadd.f32 %v602_v22, %v589_v17  ;;  %v605_v26 = vadd.f32 %v602_v22, %v593_v19  ;;  %v606_v35 = vadd.f32 %v602_v22, %v597_v30  ;;  %v775_v30 = vld [vmem:[%s1886_s8 + $0x10] sm:$0xff] }
 0x478   :  { %vm607_vm2 = vcmp.gt.f32.partialorder %v603_v24, 0.0  ;;  %v611_v28 = vmul.f32 0.2, %v603_v24  ;;  %vm608_vm3 = vcmp.gt.f32.partialorder %v604_v25, 0.0  ;;  %v612_v29 = vmul.f32 0.2, %v604_v25 }
 0x479   :  { %v613_v34 = vmul.f32 0.2, %v605_v26  ;;  %vm609_vm4 = vcmp.gt.f32.partialorder %v605_v26, 0.0  ;;  %v614_v41 = vmul.f32 0.2, %v606_v35  ;;  %vm610_vm5 = vcmp.gt.f32.partialorder %v606_v35, 0.0 }
 0x47a   :  { %v615_v31 = vsel %vm607_vm2, %v603_v24, %v611_v28  ;;  %v616_v33 = vsel %vm608_vm3, %v604_v25, %v612_v29 }
 0x47b   :  { %v619_v36 = vadd.f32 %v615_v31, %v1736_v27  ;;  %v620_v38 = vadd.f32 %v616_v33, %v1741_v32  ;;  %v617_v40 = vsel %vm609_vm4, %v605_v26, %v613_v34  ;;  %v618_v46 = vsel %vm610_vm5, %v606_v35, %v614_v41  ;;  %v776_v31 = vld [vmem:[%s1886_s8 + $0x18] sm:$0xff]  ;;  %v1274_v34 = vld [vmem:[%s1883_s9 + $0x6] ss:$0 sm:$0xff] }
 0x47c   :  { %v621_v43 = vadd.f32 %v617_v40, %v1749_v39  ;;  %v622_v50 = vadd.f32 %v618_v46, %v1756_v44  ;;  %v1490_v33 = vpack.c.bf16 %v776_v31, %v775_v30 }
 0x47d   :  { %v623_v37 = vsel %vm43_vm0, %v619_v36, -inf  ;;  %v626_v42 = vsel %vm43_vm0, %v620_v38, -inf }
 0x47e   :  { %624 = vmax.xlane.f32.xlu0 %v623_v37  ;;  %v629_v49 = vsel %vm43_vm0, %v621_v43, -inf  ;;  %v632_v52 = vsel %vm43_vm0, %v622_v50, -inf  ;;  %1491 = vmatprep.subr.bf16.mxu0 %v1490_v33 }
 0x47f   :  { %1493 = vmatpush3.bf16.msra.mxu0 %v1490_v33 }
 0x482   :  { %627 = vmax.xlane.f32.xlu0 %v626_v42 }
 0x486   :  { %630 = vmax.xlane.f32.xlu0 %v629_v49 }
 0x48a   :  { %633 = vmax.xlane.f32.xlu0 %v632_v52 }
 0x50b   :  { %v625_v54 = vpop.xlane.xlu0 %624 }
 0x50c   :  { %v635_v55 = vsub.f32 %v619_v36, %v625_v54 }
 0x50e   :  { %v639_v56 = vmul.f32 1.442695, %v635_v55 }
 0x50f   :  { %v628_v57 = vpop.xlane.xlu0 %627 }
 0x510   :  { %1507 = vpow2.f32 %v639_v56  ;;  %v636_v58 = vsub.f32 %v620_v38, %v628_v57 }
 0x512   :  { %v641_v59 = vmul.f32 1.442695, %v636_v58 }
 0x513   :  { %v631_v60 = vpop.xlane.xlu0 %630 }
 0x514   :  { %1509 = vpow2.f32 %v641_v59  ;;  %v637_v61 = vsub.f32 %v621_v43, %v631_v60 }
 0x516   :  { %v643_v62 = vmul.f32 1.442695, %v637_v61 }
 0x517   :  { %v634_v63 = vpop.xlane.xlu0 %633 }
 0x518   :  { %1511 = vpow2.f32 %v643_v62  ;;  %v638_v0 = vsub.f32 %v622_v50, %v634_v63 }
 0x51a   :  { %v1508_v1 = vpop.eup %1507  ;;  %v645_v2 = vmul.f32 1.442695, %v638_v0 }
 0x51b   :  { %v647_v3 = vsel %vm43_vm0, %v1508_v1, 0.0 }
 0x51c   :  { %1513 = vpow2.f32 %v645_v2  ;;  %648 = vadd.xlane.f32.xlu0 %v647_v3  ;;  %v1200_v3 = vmul.f32 %v1682_v45, %v1690_v48 }
 0x51e   :  { %v1510_v4 = vpop.eup %1509 }
 0x51f   :  { %v650_v5 = vsel %vm43_vm0, %v1510_v4, 0.0 }
 0x520   :  { %651 = vadd.xlane.f32.xlu0 %v650_v5 }
 0x522   :  { %v1512_v6 = vpop.eup %1511 }
 0x523   :  { %v653_v9 = vsel %vm43_vm0, %v1512_v6, 0.0 }
 0x524   :  { %654 = vadd.xlane.f32.xlu1 %v653_v9  ;;  %v1207_v9 = vadd.f32 %v1688_v47, %v1200_v3 }
 0x526   :  { %v1514_v10 = vpop.eup %1513 }
 0x527   :  { %v656_v11 = vsel %vm43_vm0, %v1514_v10, 0.0 }
 0x528   :  { %657 = vadd.xlane.f32.xlu0 %v656_v11 }
 0x5a9   :  { %v649_v15 = vpop.xlane.xlu0 %648 }
 0x5aa   :  { %1515 = vrcp.f32 %v649_v15 }
 0x5ad   :  { %v652_v16 = vpop.xlane.xlu0 %651 }
 0x5ae   :  { %1517 = vrcp.f32 %v652_v16  ;;  %v1209_v16 = vmax.f32 %v1207_v9, 0.0 }
 0x5b1   :  { %v655_v17 = vpop.xlane.xlu1 %654 }
 0x5b2   :  { %1519 = vrcp.f32 %v655_v17 }
 0x5b4   :  { %v1516_v19 = vpop.eup %1515 }
 0x5b5   :  { %v658_v21 = vpop.xlane.xlu0 %657  ;;  %v663_v22 = vmul.f32 %v1516_v19, %v1508_v1 }
 0x5b6   :  { %1521 = vrcp.f32 %v658_v21 }
 0x5b7   :  { %1412 = vmatprep.mubr.msk.f32.mxu1 %vm43_vm0, %v663_v22 }
 0x5b8   :  { %v1518_v23 = vpop.eup %1517 }
 0x5b9   :  { %v664_v24 = vmul.f32 %v1518_v23, %v1510_v4  ;;  %v1229_v23 = vmul.f32 %v1699_v51, %v1209_v16 }
 0x5bb   :  { %1413 = vmatmul.mubr.msk.f32.vlgmr.msra.gmra.mrb[4].mxu1 %vm43_vm0, %v664_v24 }
 0x5bc   :  { %v1520_v25 = vpop.eup %1519 }
 0x5bd   :  { %v665_v26 = vmul.f32 %v1520_v25, %v1512_v6 }
 0x5bf   :  { %1415 = vmatprep.mubr.msk.f32.mxu1 %vm43_vm0, %v665_v26  ;;  %v1231_v26 = vsel %vm43_vm0, %v1229_v23, 0.0  ;;  %v1299_v23 = vld [vmem:[%s1883_s9 + $0x12] ss:$0 sm:$0xff] }
 0x5c0   :  { %v1522_v28 = vpop.eup %1521 }
 0x5c1   :  { %v666_v29 = vmul.f32 %v1522_v28, %v1514_v10 }
 0x5c3   :  { %1416 = vmatmul.mubr.msk.f32.gmra.mrb[6].mxu1 %vm43_vm0, %v666_v29 }
 0x68e   :  { %v1414_v35 = vpop.f32.mrb[4].mxu1 }
 0x68f   :  { %v755_v36 = vadd.f32 %v1414_v35, %v1274_v34  ;;  %v749_v37 = vpop.f32.mrb[5].mxu1 }
 0x690   :  { %v750_v38 = vadd.f32 %v1274_v34, %v749_v37 }
 0x691   :  { %v769_v41 = vmax.f32 %v755_v36, 0.0 }
 0x692   :  { %v768_v40 = vmax.f32 %v750_v38, 0.0 }
 0x694   :  { %1426 = vmatprep.mubr.msk.f32.mxu0 %vm43_vm0, %v768_v40  ;;  %v1290_v40 = vld [vmem:[%s1883_s9 + $0x9] ss:$0 sm:$0xff] }
 0x695   :  { %1427 = vmatmul.mubr.msk.f32.vlgmr.msra.gmra.mrb[8].mxu0 %vm43_vm0, %v769_v41 }
 0x696   :  { %v1417_v42 = vpop.f32.mrb[6].mxu1 }
 0x697   :  { %v765_v43 = vadd.f32 %v1417_v42, %v1274_v34  ;;  %v759_v46 = vpop.f32.mrb[7].mxu1  ;;  %v1130_v42 = vmul.f32 %v1290_v40, %v1718_v7 }
 0x698   :  { %v760_v49 = vadd.f32 %v1274_v34, %v759_v46  ;;  %v1291_v46 = vld [vmem:[%s1883_s9 + $0xb] ss:$0 sm:$0xff] }
 0x699   :  { %v771_v52 = vmax.f32 %v765_v43, 0.0 }
 0x69a   :  { %v770_v50 = vmax.f32 %v760_v49, 0.0 }
 0x69c   :  { %1429 = vmatprep.mubr.msk.f32.mxu0 %vm43_vm0, %v770_v50 }
 0x69d   :  { %1430 = vmatmul.mubr.msk.f32.gmra.mrb[10].mxu0 %vm43_vm0, %v771_v52  ;;  %v1131_v52 = vmul.f32 %v1290_v40, %v1722_v8 }
 0x768   :  { %v1428_v54 = vpop.f32.mrb[8].mxu0 }
 0x769   :  { %880 = vrot.lane.b32.xlu0 %v1428_v54, %s1540_s26  ;;  %v855_v55 = vpop.f32.mrb[9].mxu0 }
 0x76a   :  { %v1494_v56 = vpack.c.bf16 %v1428_v54, %v855_v55  ;;  %923 = vperm.xlu1 %1506, %v855_v55  }
 0x76c   :  { %1495 = vmatprep.subr.bf16.mxu1 %v1494_v56 }
 0x76d   :  { %878 = vrot.lane.b32.xlu0 %v855_v55, %s1540_s26  ;;  %1497 = vmatpush3.bf16.msra.mxu1 %v1494_v56 }
 0x770   :  { %v1431_v57 = vpop.f32.mrb[10].mxu0 }
 0x771   :  { %v865_v58 = vpop.f32.mrb[11].mxu0 }
 0x772   :  { %v1498_v59 = vpack.c.bf16 %v1431_v57, %v865_v58  ;;  %882 = vrot.lane.b32.xlu0 %v865_v58, %s1540_s26 }
 0x774   :  { %1499 = vmatprep.subr.bf16.mxu1 %v1498_v59 }
 0x775   :  { %1501 = vmatpush3.bf16.msra.mxu1 %v1498_v59  ;;  %v1293_v59 = vld [vmem:[%s1883_s9 + $0x11] ss:$0 sm:$0xff] }
 0x776   :  { %884 = vrot.lane.b32.xlu0 %v1431_v57, %s1540_s26 }
 0x77a   :  { %927 = vperm.xlu0 %1505, %v1428_v54   ;;  %v1137_v54 = vadd.f32 %v1291_v46, %v1130_v42 }
 0x77e   :  { %935 = vperm.xlu0 %1505, %v1431_v57   ;;  %v1139_v57 = vmax.f32 %v1137_v54, 0.0 }
 0x782   :  { %931 = vperm.xlu0 %1505, %v865_v58   ;;  %v1138_v58 = vadd.f32 %v1291_v46, %v1131_v52 }
 0x7db   :  { %v881_v60 = vpop.permute.xlu0 %880 }
 0x7df   :  { %v879_v61 = vpop.permute.xlu0 %878 }
 0x7e0   :  { %890 = vxpose.xlu0.b32.start [1/4] (short) (narrow) %v879_v61, 8  ;;  %v1159_v61 = vmul.f32 %v1293_v59, %v1139_v57 }
 0x7e2   :  { %v1161_v8 = vsel %vm43_vm0, %v1159_v61, 0.0 }
 0x7e4   :  { %891 = vxpose.xlu0.b32.cont [2/4] (short) (narrow) %v881_v60, 8  ;;  %v883_v62 = vpop.permute.xlu0 %882 }
 0x7e8   :  { %892 = vxpose.xlu0.b32.cont [3/4] (short) (narrow) %v883_v62, 8  ;;  %v885_v63 = vpop.permute.xlu0 %884  ;;  %v1140_v62 = vmax.f32 %v1138_v58, 0.0 }
 0x7e9   :  { %v924_v6 = vpop.permute.xlu1 %923 }
 0x7ec   :  { %893 = vxpose.xlu0.b32.end [4/4] (short) (narrow) %v885_v63, 8  ;;  %v1160_v63 = vmul.f32 %v1293_v59, %v1140_v62  ;;  %v1294_v59 = vld [vmem:[%s1883_s9 + $0x14] ss:$0 sm:$0xff] }
 0x7f9   :  { %v928_v0 = vpop.permute.xlu0 %927 }
 0x7fd   :  { %v936_v1 = vpop.permute.xlu0 %935 }
 0x801   :  { %v932_v2 = vpop.permute.xlu0 %931 }
 0x860   :  { %v906_v4 = vpop.trf.xlu0 }
 0x861   :  { %v941_v5 = vrot.slane %v906_v4, %v601_v20 }
 0x863   :  { %v944_v10 = vadd.f32 %v941_v5, %v932_v2  ;;  %v942_v11 = vadd.f32 %v941_v5, %v924_v6  ;;  %v943_v12 = vadd.f32 %v941_v5, %v928_v0  ;;  %v945_v13 = vadd.f32 %v941_v5, %v936_v1 }
 0x864   :  { %v1164_v0 = vsel %vm43_vm0, %v1160_v63, 0.0 }
 0x865   :  { %vm948_vm6 = vcmp.gt.f32.partialorder %v944_v10, 0.0  ;;  %v952_v14 = vmul.f32 0.2, %v944_v10  ;;  %vm946_vm7 = vcmp.gt.f32.partialorder %v942_v11, 0.0  ;;  %v950_v15 = vmul.f32 0.2, %v942_v11 }
 0x866   :  { %vm947_vm8 = vcmp.gt.f32.partialorder %v943_v12, 0.0  ;;  %v951_v17 = vmul.f32 0.2, %v943_v12  ;;  %v953_v48 = vmul.f32 0.2, %v945_v13  ;;  %vm949_vm9 = vcmp.gt.f32.partialorder %v945_v13, 0.0 }
 0x867   :  { %v956_v19 = vsel %vm948_vm6, %v944_v10, %v952_v14  ;;  %v954_v45 = vsel %vm946_vm7, %v942_v11, %v950_v15  ;;  %v1283_v15 = vld [vmem:[%s1883_s9 + $0x7] ss:$0 sm:$0xff] }
 0x868   :  { %v960_v18 = vadd.f32 %v956_v19, %v1749_v39  ;;  %v958_v20 = vadd.f32 %v954_v45, %v1736_v27  ;;  %v955_v21 = vsel %vm947_vm8, %v943_v12, %v951_v17  ;;  %v957_v25 = vsel %vm949_vm9, %v945_v13, %v953_v48  ;;  %v1295_v17 = vld [vmem:[%s1883_s9 + $0xc] ss:$0 sm:$0xff]  ;;  %v1296_v48 = vld [vmem:[%s1883_s9 + $0xe] ss:$0 sm:$0xff] }
 0x869   :  { %v959_v24 = vadd.f32 %v955_v21, %v1741_v32  ;;  %v961_v39 = vadd.f32 %v957_v25, %v1756_v44 }
 0x86a   :  { %v968_v47 = vsel %vm43_vm0, %v960_v18, -inf  ;;  %v962_v22 = vsel %vm43_vm0, %v958_v20, -inf }
 0x86b   :  { %969 = vmax.xlane.f32.xlu0 %v968_v47  ;;  %963 = vmax.xlane.f32.xlu1 %v962_v22  ;;  %v965_v28 = vsel %vm43_vm0, %v959_v24, -inf  ;;  %v971_v27 = vsel %vm43_vm0, %v961_v39, -inf }
 0x86f   :  { %1232 = vadd.xlane.f32.xlu0 %v1231_v26  ;;  %966 = vmax.xlane.f32.xlu1 %v965_v28  ;;  %v1288_v26 = vld [vmem:[%s1883_s9 + $0x8] ss:$0 sm:$0xff] }
 0x873   :  { %972 = vmax.xlane.f32.xlu1 %v971_v27 }
 0x8f8   :  { %v964_v29 = vpop.xlane.xlu1 %963  ;;  %v970_v30 = vpop.xlane.xlu0 %969 }
 0x8f9   :  { %v974_v31 = vsub.f32 %v958_v20, %v964_v29  ;;  %v976_v33 = vsub.f32 %v960_v18, %v970_v30  ;;  %v1289_v30 = vld [vmem:[%s1883_s9 + $0xa] ss:$0 sm:$0xff] }
 0x8fb   :  { %v978_v51 = vmul.f32 1.442695, %v974_v31  ;;  %v982_v36 = vmul.f32 1.442695, %v976_v33 }
 0x8fc   :  { %v967_v32 = vpop.xlane.xlu1 %966 }
 0x8fd   :  { %v975_v34 = vsub.f32 %v959_v24, %v967_v32  ;;  %1523 = vpow2.f32 %v978_v51 }
 0x8ff   :  { %v980_v35 = vmul.f32 1.442695, %v975_v34 }
 0x900   :  { %v973_v37 = vpop.xlane.xlu1 %972 }
 0x901   :  { %1525 = vpow2.f32 %v980_v35  ;;  %v977_v38 = vsub.f32 %v961_v39, %v973_v37  ;;  %v1292_v37 = vld [vmem:[%s1883_s9 + $0x10] ss:$0 sm:$0xff] }
 0x902   :  { %1527 = vpow2.f32 %v982_v36 }
 0x903   :  { %v984_v44 = vmul.f32 1.442695, %v977_v38 }
 0x905   :  { %1529 = vpow2.f32 %v984_v44 }
 0x907   :  { %v1524_v41 = vpop.eup %1523 }
 0x908   :  { %v986_v43 = vsel %vm43_vm0, %v1524_v41, 0.0 }
 0x909   :  { %987 = vadd.xlane.f32.xlu1 %v986_v43 }
 0x90b   :  { %v1526_v49 = vpop.eup %1525 }
 0x90c   :  { %v989_v50 = vsel %vm43_vm0, %v1526_v49, 0.0  ;;  %v1528_v55 = vpop.eup %1527 }
 0x90d   :  { %990 = vadd.xlane.f32.xlu1 %v989_v50  ;;  %v992_v56 = vsel %vm43_vm0, %v1528_v55, 0.0 }
 0x90f   :  { %v1530_v7 = vpop.eup %1529 }
 0x910   :  { %v995_v60 = vsel %vm43_vm0, %v1530_v7, 0.0 }
 0x911   :  { %993 = vadd.xlane.f32.xlu1 %v992_v56  ;;  %v1301_v56 = vld [vmem:[%s1883_s9 + $0x15] ss:$0 sm:$0xff] }
 0x915   :  { %996 = vadd.xlane.f32.xlu1 %v995_v60 }
 0x919   :  { %1162 = vadd.xlane.f32.xlu1 %v1161_v8 }
 0x91d   :  { %1165 = vadd.xlane.f32.xlu1 %v1164_v0 }
 0x996   :  { %v988_v1 = vpop.xlane.xlu1 %987 }
 0x997   :  { %1531 = vrcp.f32 %v988_v1 }
 0x99a   :  { %v991_v2 = vpop.xlane.xlu1 %990 }
 0x99b   :  { %1533 = vrcp.f32 %v991_v2 }
 0x99e   :  { %v994_v3 = vpop.xlane.xlu1 %993 }
 0x99f   :  { %1535 = vrcp.f32 %v994_v3 }
 0x9a1   :  { %v1532_v4 = vpop.eup %1531 }
 0x9a2   :  { %v997_v5 = vpop.xlane.xlu1 %996  ;;  %v1002_v6 = vmul.f32 %v1532_v4, %v1524_v41 }
 0x9a3   :  { %1537 = vrcp.f32 %v997_v5 }
 0x9a4   :  { %1440 = vmatprep.mubr.msk.f32.mxu1 %vm43_vm0, %v1002_v6 }
 0x9a5   :  { %v1534_v9 = vpop.eup %1533 }
 0x9a6   :  { %v1003_v10 = vmul.f32 %v1534_v9, %v1526_v49  ;;  %v1234_v49 = vsel %vm43_vm0, %v1702_v53, 0.0  ;;  %v1163_v50 = vpop.xlane.xlu1 %1162 }
 0x9a8   :  { %1441 = vmatmul.mubr.msk.f32.vlgmr.msra.gmra.mrb[8].mxu1 %vm43_vm0, %v1003_v10 }
 0x9a9   :  { %v1536_v11 = vpop.eup %1535 }
 0x9aa   :  { %v1004_v12 = vmul.f32 %v1536_v11, %v1528_v55  ;;  %v1166_v52 = vpop.xlane.xlu1 %1165  ;;  %v1233_v55 = vpop.xlane.xlu0 %1232 }
 0x9ac   :  { %1443 = vmatprep.mubr.msk.f32.mxu1 %vm43_vm0, %v1004_v12 }
 0x9ad   :  { %v1538_v13 = vpop.eup %1537 }
 0x9ae   :  { %v1005_v14 = vmul.f32 %v1538_v13, %v1530_v7 }
 0x9b0   :  { %1444 = vmatmul.mubr.msk.f32.gmra.mrb[10].mxu1 %vm43_vm0, %v1005_v14 }
 0xa7b   :  { %v1442_v16 = vpop.f32.mrb[8].mxu1 }
 0xa7c   :  { %v1094_v19 = vadd.f32 %v1442_v16, %v1283_v15  ;;  %v1088_v45 = vpop.f32.mrb[9].mxu1 }
 0xa7d   :  { %v1089_v18 = vadd.f32 %v1283_v15, %v1088_v45 }
 0xa7e   :  { %v1185_v20 = vmul.f32 %v1295_v17, %v1094_v19 }
 0xa7f   :  { %v1184_v21 = vmul.f32 %v1295_v17, %v1089_v18 }
 0xa80   :  { %v1192_v47 = vadd.f32 %v1296_v48, %v1185_v20 }
 0xa81   :  { %v1191_v22 = vadd.f32 %v1296_v48, %v1184_v21 }
 0xa82   :  { %v1194_v24 = vmax.f32 %v1192_v47, 0.0 }
 0xa83   :  { %v1445_v25 = vpop.f32.mrb[10].mxu1  ;;  %v1193_v28 = vmax.f32 %v1191_v22, 0.0 }
 0xa84   :  { %v1104_v39 = vadd.f32 %v1445_v25, %v1283_v15  ;;  %v1098_v27 = vpop.f32.mrb[11].mxu1  ;;  %v1217_v29 = vmul.f32 %v1299_v23, %v1194_v24 }
 0xa85   :  { %v1099_v31 = vadd.f32 %v1283_v15, %v1098_v27  ;;  %v1216_v32 = vmul.f32 %v1299_v23, %v1193_v28 }
 0xa86   :  { %v1115_v51 = vmul.f32 %v1288_v26, %v1104_v39  ;;  %v1221_v33 = vsel %vm43_vm0, %v1217_v29, 0.0 }
 0xa87   :  { %v1114_v34 = vmul.f32 %v1288_v26, %v1099_v31  ;;  %1222 = vadd.xlane.f32.xlu1 %v1221_v33  ;;  %v1218_v38 = vsel %vm43_vm0, %v1216_v32, 0.0 }
 0xa88   :  { %v1122_v35 = vadd.f32 %v1289_v30, %v1115_v51 }
 0xa89   :  { %v1121_v36 = vadd.f32 %v1289_v30, %v1114_v34 }
 0xa8a   :  { %v1124_v44 = vmax.f32 %v1122_v35, 0.0 }
 0xa8b   :  { %1219 = vadd.xlane.f32.xlu1 %v1218_v38  ;;  %v1123_v40 = vmax.f32 %v1121_v36, 0.0 }
 0xa8c   :  { %v1147_v41 = vmul.f32 %v1292_v37, %v1124_v44 }
 0xa8d   :  { %v1146_v43 = vmul.f32 %v1292_v37, %v1123_v40 }
 0xa8e   :  { %v1151_v42 = vsel %vm43_vm0, %v1147_v41, 0.0 }
 0xa8f   :  { %1152 = vadd.xlane.f32.xlu1 %v1151_v42  ;;  %v1148_v46 = vsel %vm43_vm0, %v1146_v43, 0.0 }
 0xa93   :  { %1149 = vadd.xlane.f32.xlu1 %v1148_v46 }
 0xa97   :  { %1235 = vadd.xlane.f32.xlu1 %v1234_v49 }
 0xb14   :  { %v1223_v54 = vpop.xlane.xlu1 %1222 }
 0xb18   :  { %v1220_v57 = vpop.xlane.xlu1 %1219 }
 0xb19   :  { %v1237_v58 = vadd.f32 %v1233_v55, %v1220_v57 }
 0xb1b   :  { %v1244_v7 = vadd.f32 %v1301_v56, %v1237_v58 }
 0xb1c   :  { %v1153_v60 = vpop.xlane.xlu1 %1152 }
 0xb1d   :  { %1246 = vst.msk [vmem:[%s1887_s10] sm:$0xff] %vm1176_vm10, %v1244_v7  ;;  %v1168_v53 = vadd.f32 %v1166_v52, %v1153_v60 }
 0xb1f   :  { %v1175_v61 = vadd.f32 %v1294_v59, %v1168_v53 }
 0xb20   :  { %v1150_v62 = vpop.xlane.xlu1 %1149 }
 0xb21   :  { %1178 = vst.msk [vmem:[%s1888_s11 + $0x8] sm:$0xff] %vm1176_vm10, %v1175_v61  ;;  %v1167_v8 = vadd.f32 %v1163_v50, %v1150_v62 }
 0xb23   :  { %v1174_v63 = vadd.f32 %v1294_v59, %v1167_v8 }
 0xb24   :  { %v1236_v0 = vpop.xlane.xlu1 %1235 }
 0xb25   :  { %1177 = vst.msk [vmem:[%s1888_s11] sm:$0xff] %vm1176_vm10, %v1174_v63  ;;  %v1238_v1 = vadd.f32 %v1236_v0, %v1223_v54 }
 0xb27   :  { %v1245_v2 = vadd.f32 %v1301_v56, %v1238_v1 }
 0xb29   :  { %1247 = vst.msk [vmem:[%s1887_s10 + $0x8] sm:$0xff] %vm1176_vm10, %v1245_v2 }

</bundles_post_ra>
